<compile_context>
chip_gen: v7x
topology: tpu7x:2x2x1
jax: 0.10.0
libtpu: 0.0.40
codegen_flags: <defaults>
</compile_context>

<pallas_src>
import functools

import jax
import jax.numpy as jnp
from jax.experimental import pallas as pl
from jax.experimental.pallas import tpu as pltpu


def _round_up(x, m):
    return (x + m - 1) // m * m


# ----------------------------------------------------------------------------
# Fused kernel: clip-scale scores (max over proposals) + gt-rank count.
#   grid = (n_q_p // tm, n_v_p // tn); video axis is the reduction ("arbitrary").
# ----------------------------------------------------------------------------
def _fused_score_rank_kernel(q_ref, v_ref, gt_ref, rank_ref, cnt_ref,
                             *, n_prop, n_v_valid, n_v_padded):
    j = pl.program_id(1)

    @pl.when(j == 0)
    def _init():
        cnt_ref[...] = jnp.zeros_like(cnt_ref)

    q = q_ref[...]                                            # (tm, d_p) bf16
    # scores tile: max over the P proposals of a plain (m,k)x(k,n) bf16->f32 MXU dot;
    # proposals are consumed in their native (d_p, tn) layout (no transpose).
    s_tile = jnp.dot(q, v_ref[0], preferred_element_type=jnp.float32)
    for p in range(1, n_prop):
        s_tile = jnp.maximum(
            s_tile, jnp.dot(q, v_ref[p], preferred_element_type=jnp.float32))

    # rank count: strictly-greater-than-gt per query row.
    hit = s_tile > gt_ref[...]                                # (tm, tn) bool
    if n_v_padded > n_v_valid:                                # traced only if padding exists
        tm, tn = s_tile.shape
        col = jax.lax.broadcasted_iota(jnp.int32, (tm, tn), 1) + j * tn
        hit = jnp.logical_and(hit, col < n_v_valid)
    cnt_ref[...] += jnp.sum(hit.astype(jnp.int32), axis=-1, keepdims=True)

    @pl.when(j == pl.num_programs(1) - 1)
    def _store():
        # lane-dense store: broadcast the per-query rank across 128 lanes.
        rank_ref[...] = jnp.broadcast_to(cnt_ref[...] + 1, rank_ref.shape)


def fused_gt_ranks(query_emb, vid_prop_pdv, gt_score):
    """query_emb: (n_q, d) f32, vid_prop_pdv: (P, d, n_v) f32, gt_score: (n_q,) f32
       -> 1-based ranks of the ground-truth video per query, (n_q,) int32."""
    n_q, d = query_emb.shape
    n_prop, _, n_v = vid_prop_pdv.shape

    # MXU-friendly tiles at production scale, minimal legal tiles at toy scale.
    tm = 512 if n_q >= 512 else _round_up(n_q, 8)
    tn = 256 if n_v >= 256 else _round_up(n_v, 128)
    d_p = _round_up(d, 256)          # 256-multiple K for the v6e/v7x 2x256^2 MXU
    n_q_p = _round_up(n_q, tm)
    n_v_p = _round_up(n_v, tn)

    q = jnp.pad(query_emb.astype(jnp.bfloat16),
                ((0, n_q_p - n_q), (0, d_p - d)))
    v = jnp.pad(vid_prop_pdv.astype(jnp.bfloat16),
                ((0, 0), (0, d_p - d), (0, n_v_p - n_v)))
    gts = jnp.pad(gt_score.astype(jnp.float32), (0, n_q_p - n_q)).reshape(n_q_p, 1)

    grid = (n_q_p // tm, n_v_p // tn)
    flops = 2 * n_q_p * n_v_p * d_p * n_prop
    bytes_accessed = int(q.size * 2 + v.size * 2 * grid[0]
                         + gts.size * 4 + n_q_p * 128 * 4)

    ranks = pl.pallas_call(
        functools.partial(_fused_score_rank_kernel,
                          n_prop=n_prop, n_v_valid=n_v, n_v_padded=n_v_p),
        out_shape=jax.ShapeDtypeStruct((n_q_p, 128), jnp.int32),
        grid=grid,
        in_specs=[
            pl.BlockSpec((tm, d_p), lambda i, j: (i, 0)),
            pl.BlockSpec((n_prop, d_p, tn), lambda i, j: (0, 0, j)),
            pl.BlockSpec((tm, 1), lambda i, j: (i, 0)),
        ],
        out_specs=pl.BlockSpec((tm, 128), lambda i, j: (i, 0)),
        scratch_shapes=[pltpu.VMEM((tm, 1), jnp.int32)],
        compiler_params=pltpu.CompilerParams(
            dimension_semantics=("parallel", "arbitrary"),
            vmem_limit_bytes=32 * 1024 * 1024),
        cost_estimate=pl.CostEstimate(
            flops=flops, transcendentals=0, bytes_accessed=bytes_accessed),
    )(q, v, gts)
    return ranks[:n_q, 0]


# ----------------------------------------------------------------------------
# Plain-Python reproduction of get_gt (string metadata bookkeeping).
# ----------------------------------------------------------------------------
def get_gt(video_metas, query_metas):
    v2t_gt = []
    for vid_id in video_metas:
        v2t_gt.append([])
        for i, query_id in enumerate(query_metas):
            if query_id.split('#', 1)[0] == vid_id:
                v2t_gt[-1].append(i)
    t2v_gt = {}
    for i, t_gts in enumerate(v2t_gt):
        for t_gt in t_gts:
            t2v_gt.setdefault(t_gt, [])
            t2v_gt[t_gt].append(i)
    return v2t_gt, t2v_gt


# ----------------------------------------------------------------------------
# End-to-end "validations" forward on synthetic encoders + data.
# ----------------------------------------------------------------------------
def validations_forward(query_feat, query_mask, clip_video_feat,
                        w_query, w_video, video_metas, query_metas):
    # --- glue: deterministic linear "encoders" (stand-in for model.encode_*) ---
    denom = jnp.maximum(jnp.sum(query_mask, axis=1, keepdims=True), 1.0)
    q_pooled = jnp.sum(query_feat * query_mask[:, :, None], axis=1) / denom
    query_emb = q_pooled @ w_query                                    # (n_q, d)
    # proposals emitted directly in (P, d, n_v) layout so the kernel does plain MN dots
    vid_prop_pdv = jnp.einsum('vpf,fd->pdv', clip_video_feat, w_video)

    n_q = query_emb.shape[0]
    n_v = vid_prop_pdv.shape[2]

    # --- gt scores per query (tiny gather + einsum with the same bf16/f32 arithmetic
    #     as the kernel; supports multiple gt videos per query: the min rank over gts
    #     equals 1 + #{v: score[v] > max_gt score[gt]} under the counting definition) ---
    _, t2v_gt = get_gt(video_metas, query_metas)
    pairs_q, pairs_v = [], []
    for qi in range(len(query_metas)):
        for vi in t2v_gt.get(qi, []):
            pairs_q.append(qi)
            pairs_v.append(vi)
    pairs_q = jnp.asarray(pairs_q, dtype=jnp.int32)
    pairs_v = jnp.asarray(pairs_v, dtype=jnp.int32)

    q_bf = query_emb.astype(jnp.bfloat16)
    gt_props = vid_prop_pdv.astype(jnp.bfloat16)[:, :, pairs_v]       # (P, d, n_pairs)
    pair_scores = jnp.einsum('nd,pdn->pn', q_bf[pairs_q], gt_props,
                             preferred_element_type=jnp.float32).max(axis=0)
    gt_score = jnp.full((n_q,), -jnp.inf, jnp.float32).at[pairs_q].max(pair_scores)
    # TODO(synk): ties are resolved as "best rank among equal scores"; torch.argsort's
    # (unspecified) tie order in eval_q2m can differ by +/-1 on exact ties.

    # --- Pallas hot path: fused scores + gt-rank count (no dense score matrix in HBM) ---
    ranks = fused_gt_ranks(query_emb, vid_prop_pdv, gt_score).astype(jnp.float32)

    # --- glue: recall@K reduction (tiny) ---
    r1 = 100.0 * jnp.sum(ranks <= 1) / n_q
    r5 = 100.0 * jnp.sum(ranks <= 5) / n_q
    r10 = 100.0 * jnp.sum(ranks <= 10) / n_q
    r100 = 100.0 * jnp.sum(ranks <= 100) / n_q
    rsum = r1 + r5 + r10 + r100
    return [r1, r5, r10, r100, rsum]


if __name__ == "__main__":
    key = jax.random.PRNGKey(0)
    n_q, seq, feat_dim = 8, 8, 32     # queries
    n_v, n_prop, d = 16, 4, 32        # videos / proposals / hidden dim

    k1, k2, k3, k4 = jax.random.split(key, 4)
    query_feat = jax.random.normal(k1, (n_q, seq, feat_dim), dtype=jnp.float32)
    query_mask = jnp.ones((n_q, seq), dtype=jnp.float32)
    clip_video_feat = jax.random.normal(k2, (n_v, n_prop, feat_dim),
                                        dtype=jnp.float32)

    # deterministic "parameters" (synthetic encoders)
    w_query = jax.random.normal(k3, (feat_dim, d), dtype=jnp.float32) * 0.1
    w_video = jax.random.normal(k4, (feat_dim, d), dtype=jnp.float32) * 0.1

    # synthetic metadata: query i belongs to video i % n_v
    video_metas = [f"vid{v}" for v in range(n_v)]
    query_metas = [f"vid{i % n_v}#cap{i}" for i in range(n_q)]

    out = validations_forward(query_feat, query_mask, clip_video_feat,
                              w_query, w_video, video_metas, query_metas)
    out = [jax.block_until_ready(x) for x in out]
    print("KERNEL_OK")
</pallas_src>

<mosaic_0001>
module attributes {stable_mosaic.version = 11 : i64} {
  func.func @_fused_score_rank_kernel(%arg0: i32, %arg1: i32, %arg2: memref<8x256xbf16, #tpu.memory_space<vmem>>, %arg3: memref<4x256x128xbf16, #tpu.memory_space<vmem>>, %arg4: memref<8x1xf32, #tpu.memory_space<vmem>>, %arg5: memref<8x128xi32, #tpu.memory_space<vmem>>, %arg6: memref<8x1xi32, #tpu.memory_space<vmem>>) attributes {dimension_semantics = [#tpu.dimension_semantics<parallel>, #tpu.dimension_semantics<arbitrary>], iteration_bounds = array<i64: 1, 1>, scalar_prefetch = 0 : i64, scratch_operands = 1 : i64, tpu.core_type = #tpu.core_type<tc>, window_params = [{transform_indices = @transform_0, window_bounds = array<i64: 8, 256>}, {transform_indices = @transform_1, window_bounds = array<i64: 4, 256, 128>}, {transform_indices = @transform_2, window_bounds = array<i64: 8, 1>}, {transform_indices = @transform_3, window_bounds = array<i64: 8, 128>}]} {
    %c0_i32 = arith.constant 0 : i32
    %0 = arith.cmpi eq, %arg1, %c0_i32 : i32
    %1 = arith.extui %0 : i1 to i32
    %c0_i32_0 = arith.constant 0 : i32
    %2 = arith.cmpi ne, %1, %c0_i32_0 : i32
    scf.if %2 {
      %c0_i32_23 = arith.constant 0 : i32
      %38 = vector.broadcast %c0_i32_23 : i32 to vector<8x1xi32>
      %c0_24 = arith.constant 0 : index
      %c0_25 = arith.constant 0 : index
      %39 = vector.load %arg6[%c0_24, %c0_25] : memref<8x1xi32, #tpu.memory_space<vmem>>, vector<8x1xi32>
      tpu.vector_store %arg6[%c0_24, %c0_25], %38 {strides = array<i32>} : memref<8x1xi32, #tpu.memory_space<vmem>>, vector<8x1xi32>,
    } else {
    }
    %c0 = arith.constant 0 : index
    %c0_1 = arith.constant 0 : index
    %3 = vector.load %arg2[%c0, %c0_1] : memref<8x256xbf16, #tpu.memory_space<vmem>>, vector<8x256xbf16>
    %c0_2 = arith.constant 0 : index
    %c0_3 = arith.constant 0 : index
    %c0_4 = arith.constant 0 : index
    %4 = vector.load %arg3[%c0_2, %c0_3, %c0_4] : memref<4x256x128xbf16, #tpu.memory_space<vmem>>, vector<1x256x128xbf16>
    %5 = vector.shape_cast %4 : vector<1x256x128xbf16> to vector<256x128xbf16>
    %cst = arith.constant dense<0.000000e+00> : vector<8x128xf32>
    %6 = tpu.matmul %3, %5, %cst {dimension_numbers = #tpu.dot_dimension_numbers<[1], [0], [0], [1], [0, 0, 1, 1], [], []>} : vector<8x256xbf16>, vector<256x128xbf16>, vector<8x128xf32> -> vector<8x128xf32>
    %c1 = arith.constant 1 : index
    %c0_5 = arith.constant 0 : index
    %c0_6 = arith.constant 0 : index
    %7 = vector.load %arg3[%c1, %c0_5, %c0_6] : memref<4x256x128xbf16, #tpu.memory_space<vmem>>, vector<1x256x128xbf16>
    %8 = vector.shape_cast %7 : vector<1x256x128xbf16> to vector<256x128xbf16>
    %cst_7 = arith.constant dense<0.000000e+00> : vector<8x128xf32>
    %9 = tpu.matmul %3, %8, %cst_7 {dimension_numbers = #tpu.dot_dimension_numbers<[1], [0], [0], [1], [0, 0, 1, 1], [], []>} : vector<8x256xbf16>, vector<256x128xbf16>, vector<8x128xf32> -> vector<8x128xf32>
    %10 = arith.maximumf %6, %9 : vector<8x128xf32>
    %c2 = arith.constant 2 : index
    %c0_8 = arith.constant 0 : index
    %c0_9 = arith.constant 0 : index
    %11 = vector.load %arg3[%c2, %c0_8, %c0_9] : memref<4x256x128xbf16, #tpu.memory_space<vmem>>, vector<1x256x128xbf16>
    %12 = vector.shape_cast %11 : vector<1x256x128xbf16> to vector<256x128xbf16>
    %cst_10 = arith.constant dense<0.000000e+00> : vector<8x128xf32>
    %13 = tpu.matmul %3, %12, %cst_10 {dimension_numbers = #tpu.dot_dimension_numbers<[1], [0], [0], [1], [0, 0, 1, 1], [], []>} : vector<8x256xbf16>, vector<256x128xbf16>, vector<8x128xf32> -> vector<8x128xf32>
    %14 = arith.maximumf %10, %13 : vector<8x128xf32>
    %c3 = arith.constant 3 : index
    %c0_11 = arith.constant 0 : index
    %c0_12 = arith.constant 0 : index
    %15 = vector.load %arg3[%c3, %c0_11, %c0_12] : memref<4x256x128xbf16, #tpu.memory_space<vmem>>, vector<1x256x128xbf16>
    %16 = vector.shape_cast %15 : vector<1x256x128xbf16> to vector<256x128xbf16>
    %cst_13 = arith.constant dense<0.000000e+00> : vector<8x128xf32>
    %17 = tpu.matmul %3, %16, %cst_13 {dimension_numbers = #tpu.dot_dimension_numbers<[1], [0], [0], [1], [0, 0, 1, 1], [], []>} : vector<8x256xbf16>, vector<256x128xbf16>, vector<8x128xf32> -> vector<8x128xf32>
    %18 = arith.maximumf %14, %17 : vector<8x128xf32>
    %c0_14 = arith.constant 0 : index
    %c0_15 = arith.constant 0 : index
    %19 = vector.load %arg4[%c0_14, %c0_15] : memref<8x1xf32, #tpu.memory_space<vmem>>, vector<8x1xf32>
    %20 = vector.broadcast %19 : vector<8x1xf32> to vector<8x128xf32>
    %21 = arith.cmpf ogt, %18, %20 : vector<8x128xf32>
    %22 = tpu.iota {dimensions = array<i32: 1>} : vector<8x128xi32>
    %c128_i32 = arith.constant 128 : i32
    %23 = arith.muli %arg1, %c128_i32 : i32
    %24 = vector.broadcast %23 : i32 to vector<8x128xi32>
    %25 = arith.addi %22, %24 : vector<8x128xi32>
    %c16_i32 = arith.constant 16 : i32
    %26 = vector.broadcast %c16_i32 : i32 to vector<8x128xi32>
    %27 = arith.cmpi slt, %25, %26 : vector<8x128xi32>
    %28 = arith.andi %21, %27 : vector<8x128xi1>
    %c0_16 = arith.constant 0 : index
    %c0_17 = arith.constant 0 : index
    %29 = vector.load %arg6[%c0_16, %c0_17] : memref<8x1xi32, #tpu.memory_space<vmem>>, vector<8x1xi32>
    %30 = arith.extui %28 : vector<8x128xi1> to vector<8x128xi32>
    %cst_18 = arith.constant dense<0> : vector<8xi32>
    %31 = vector.multi_reduction <add>, %30, %cst_18 [1] : vector<8x128xi32> to vector<8xi32>
    %32 = vector.shape_cast %31 : vector<8xi32> to vector<8x1xi32>
    %33 = arith.addi %29, %32 : vector<8x1xi32>
    %c0_19 = arith.constant 0 : index
    %c0_20 = arith.constant 0 : index
    %34 = vector.load %arg6[%c0_19, %c0_20] : memref<8x1xi32, #tpu.memory_space<vmem>>, vector<8x1xi32>
    tpu.vector_store %arg6[%c0_19, %c0_20], %33 {strides = array<i32>} : memref<8x1xi32, #tpu.memory_space<vmem>>, vector<8x1xi32>,
    %c0_i32_21 = arith.constant 0 : i32
    %35 = arith.cmpi eq, %arg1, %c0_i32_21 : i32
    %36 = arith.extui %35 : i1 to i32
    %c0_i32_22 = arith.constant 0 : i32
    %37 = arith.cmpi ne, %36, %c0_i32_22 : i32
    scf.if %37 {
      %c0_23 = arith.constant 0 : index
      %c0_24 = arith.constant 0 : index
      %38 = vector.load %arg6[%c0_23, %c0_24] : memref<8x1xi32, #tpu.memory_space<vmem>>, vector<8x1xi32>
      %c1_i32 = arith.constant 1 : i32
      %39 = vector.broadcast %c1_i32 : i32 to vector<8x1xi32>
      %40 = arith.addi %38, %39 : vector<8x1xi32>
      %41 = vector.shape_cast %40 : vector<8x1xi32> to vector<8x1xi32>
      %42 = vector.broadcast %41 : vector<8x1xi32> to vector<8x128xi32>
      %c0_25 = arith.constant 0 : index
      %c0_26 = arith.constant 0 : index
      %43 = vector.load %arg5[%c0_25, %c0_26] : memref<8x128xi32, #tpu.memory_space<vmem>>, vector<8x128xi32>
      tpu.vector_store %arg5[%c0_25, %c0_26], %42 {strides = array<i32>} : memref<8x128xi32, #tpu.memory_space<vmem>>, vector<8x128xi32>,
    } else {
    }
    return
  }
  func.func @transform_0(%arg0: i32, %arg1: i32) -> (i32, i32) {
    %c0_i32 = arith.constant 0 : i32
    %c0_i32_0 = arith.constant 0 : i32
    return %arg0, %c0_i32 : i32, i32
  }
  func.func @transform_1(%arg0: i32, %arg1: i32) -> (i32, i32, i32) {
    %c0_i32 = arith.constant 0 : i32
    %c0_i32_0 = arith.constant 0 : i32
    %c0_i32_1 = arith.constant 0 : i32
    return %c0_i32, %c0_i32_0, %arg1 : i32, i32, i32
  }
  func.func @transform_2(%arg0: i32, %arg1: i32) -> (i32, i32) {
    %c0_i32 = arith.constant 0 : i32
    %c0_i32_0 = arith.constant 0 : i32
    return %arg0, %c0_i32 : i32, i32
  }
  func.func @transform_3(%arg0: i32, %arg1: i32) -> (i32, i32) {
    %c0_i32 = arith.constant 0 : i32
    %c0_i32_0 = arith.constant 0 : i32
    return %arg0, %c0_i32 : i32, i32
  }
}

</mosaic_0001>

<bundles_post_ra>
// kernel: tpu_custom_call.1
= control target key start
LH: loop header
LB: loop body
LE: loop exit
PB: predicated region body
PF: predicated region fallthrough
CT: control target
= control target key end

     0   :  { %8 = vsyncpa [#allocation4], 0  ;;  %s1119_s0 = inlined_call_operand.vmem [shape: bf16[8,256], index: 0, kind: input, shape index: {}]   ;;  %s1120_s1 = inlined_call_operand.hbm [shape: bf16[4,256,128], index: 1, kind: input, shape index: {}]   ;;  %s1121_s2 = inlined_call_operand.vmem [shape: f32[8,1], index: 2, kind: input, shape index: {}]   ;;  %s1122_s3 = inlined_call_operand.hbm [shape: s32[8,128], index: 3, kind: output, shape index: {}]  }
   0x1   :  { %9 = vsyncpa [#allocation5], 0  ;;  %s1052_s12 = smov [#allocation3]   ;;  %s1004_s16 = scalar_lea.hbm %s1120_s1, 8192 }
   0x2   :  { %s17_s13 = sshll.u32 %s1052_s12, 4  ;;  %p1005_p0 = scmp.ne.s32.totalorder %s1120_s1, %s1004_s16  ;;  %s18_s13 = int_to_ptr.vmem [resolvable:$true] %s17_s13 }
   0x3   :  { %p1008_p1 = scmp.lt.u32.totalorder %s1004_s16, %s1120_s1 }
   0x5   :  { %p1010_p2 = pnand %p1008_p1, %p1005_p0 }
   0x7   :  { %1013 = shalt.err (!%p1010_p2)
}
   0x8   :  { %s1014_s21 = scalar_lea.vmem %s18_s13, 8192  ;;  %p1019_p4 = scmp.lt.s32.totalorder %s18_s13, %s18_s13 }
   0x9   :  { %p1015_p3 = scmp.ne.s32.totalorder %s18_s13, %s1014_s21  ;;  %p1020_p5 = scmp.lt.s32.totalorder %s1014_s21, %s1014_s21 }
   0xb   :  { %p1021_p6 = por %p1020_p5, %p1019_p4 }
   0xd   :  { %p1022_p7 = pnand %p1021_p6, %p1015_p3 }
   0xf   :  { %1025 = shalt.err (!%p1022_p7)
}
  0x10   :  { %s1053_s22 = smov 64   ;;  %s1054_s23 = smov 4  }
  0x11   :  { %23 = dma.hbm_to_vmem [thread:$0]  %s1120_s1, 8192, %s18_s13, [#allocation4], %s1053_s22, %s1053_s22, %s1054_s23  }
  0x12   :  { %1048 = dma.done.wait [#allocation4], 8192  }
  0x13   :  { %1049 = vsyncadd [#allocation4], 4294959104  ;;  %vm34_vm0 = vcmask 7168   ;;  %v1055_v0 = vmov 0   ;;  %v938_v1 = vld [vmem:[#allocation3 + $0x40] sm:$0xff]   ;;  %v942_v5 = vld [vmem:[#allocation3 + $0x48] sm:$0xff]  }
  0x14   :  { %936 = vset.pattern.permute.xlu0 %v1055_v0  ;;  %35 = vst.msk [vmem:[#allocation2] sm:$0xff] %vm34_vm0, %v1055_v0  ;;  %937 = vset.pattern.permute.xlu1 %v1055_v0  ;;  %v939_v2 = vld [vmem:[#allocation3 + $0xc0] sm:$0xff]   ;;  %v943_v6 = vld [vmem:[#allocation3 + $0xc8] sm:$0xff]   ;;  %v946_v9 = vld [vmem:[#allocation3 + $0x50] sm:$0xff]  }
  0x15   :  { %843 = vmatprep.subr.bf16.mxu0 %v938_v1  ;;  %v940_v3 = vld [vmem:[#allocation3] sm:$0xff]   ;;  %865 = vmatprep.subr.bf16.mxu1 %v939_v2  ;;  %v944_v7 = vld [vmem:[#allocation3 + $0x8] sm:$0xff]   ;;  %v947_v10 = vld [vmem:[#allocation3 + $0xd0] sm:$0xff]  }
  0x16   :  { %v941_v4 = vld [vmem:[#allocation3 + $0x80] sm:$0xff]   ;;  %844 = vmatpush3.bf16.msra.mxu0 %v940_v3  ;;  %v945_v8 = vld [vmem:[#allocation3 + $0x88] sm:$0xff]   ;;  %v948_v11 = vld [vmem:[#allocation3 + $0x10] sm:$0xff]  }
  0x17   :  { %866 = vmatpush3.bf16.msra.mxu1 %v941_v4  ;;  %845 = vmatprep.subr.bf16.mxu0 %v942_v5  ;;  %v949_v12 = vld [vmem:[#allocation3 + $0x90] sm:$0xff]   ;;  %v950_v13 = vld [vmem:[#allocation3 + $0x58] sm:$0xff]   ;;  %v954_v17 = vld [vmem:[#allocation3 + $0x60] sm:$0xff]  }
  0x18   :  { %867 = vmatprep.subr.bf16.mxu1 %v943_v6  ;;  %v951_v14 = vld [vmem:[#allocation3 + $0xd8] sm:$0xff]   ;;  %v955_v18 = vld [vmem:[#allocation3 + $0xe0] sm:$0xff]   ;;  %v958_v21 = vld [vmem:[#allocation3 + $0x68] sm:$0xff]  }
  0x19   :  { %v952_v15 = vld [vmem:[#allocation3 + $0x18] sm:$0xff]   ;;  %v956_v19 = vld [vmem:[#allocation3 + $0x20] sm:$0xff]   ;;  %v959_v22 = vld [vmem:[#allocation3 + $0xe8] sm:$0xff]  }
  0x1a   :  { %846 = vmatpush3.bf16.msra.mxu0 %v944_v7  ;;  %v953_v16 = vld [vmem:[#allocation3 + $0x98] sm:$0xff]   ;;  %v957_v20 = vld [vmem:[#allocation3 + $0xa0] sm:$0xff]   ;;  %v960_v23 = vld [vmem:[#allocation3 + $0x28] sm:$0xff]  }
  0x1b   :  { %868 = vmatpush3.bf16.msra.mxu1 %v945_v8  ;;  %847 = vmatprep.subr.bf16.mxu0 %v946_v9  ;;  %v961_v24 = vld [vmem:[#allocation3 + $0xa8] sm:$0xff]   ;;  %v962_v25 = vld [vmem:[#allocation3 + $0x70] sm:$0xff]   ;;  %v966_v29 = vld [vmem:[#allocation3 + $0x78] sm:$0xff]  }
  0x1c   :  { %869 = vmatprep.subr.bf16.mxu1 %v947_v10  ;;  %v963_v26 = vld [vmem:[#allocation3 + $0xf0] sm:$0xff]   ;;  %v967_v30 = vld [vmem:[#allocation3 + $0xf8] sm:$0xff]   ;;  %v972_v36 = vld [vmem:[#allocation3 + $0x140] sm:$0xff]  }
  0x1d   :  { %v964_v27 = vld [vmem:[#allocation3 + $0x30] sm:$0xff]   ;;  %v968_v31 = vld [vmem:[#allocation3 + $0x38] sm:$0xff]   ;;  %v973_v37 = vld [vmem:[#allocation3 + $0x1c0] sm:$0xff]  }
  0x1e   :  { %848 = vmatpush3.bf16.msra.mxu0 %v948_v11  ;;  %v965_v28 = vld [vmem:[#allocation3 + $0xb0] sm:$0xff]   ;;  %v969_v32 = vld [vmem:[#allocation3 + $0xb8] sm:$0xff]   ;;  %v974_v38 = vld [vmem:[#allocation3 + $0x100] sm:$0xff]  }
  0x1f   :  { %870 = vmatpush3.bf16.msra.mxu1 %v949_v12  ;;  %849 = vmatprep.subr.bf16.mxu0 %v950_v13  ;;  %v36_v33 = vld [vmem:[%s1119_s0] sm:$0xff]  ;;  %v975_v39 = vld [vmem:[#allocation3 + $0x180] sm:$0xff]   ;;  %v976_v40 = vld [vmem:[#allocation3 + $0x148] sm:$0xff]  }
  0x20   :  { %871 = vmatprep.subr.bf16.mxu1 %v951_v14  ;;  %v778_v34 = vcombine.high %v36_v33, %v36_v33  ;;  %v1096_v35 = vcombine.low %v36_v33, %v36_v33  ;;  %v977_v41 = vld [vmem:[#allocation3 + $0x1c8] sm:$0xff]   ;;  %v980_v44 = vld [vmem:[#allocation3 + $0x150] sm:$0xff]   ;;  %v984_v48 = vld [vmem:[#allocation3 + $0x158] sm:$0xff]  }
  0x21   :  { %v978_v42 = vld [vmem:[#allocation3 + $0x108] sm:$0xff]   ;;  %v981_v45 = vld [vmem:[#allocation3 + $0x1d0] sm:$0xff]   ;;  %v985_v49 = vld [vmem:[#allocation3 + $0x1d8] sm:$0xff]  }
  0x22   :  { %850 = vmatpush3.bf16.msra.mxu0 %v952_v15  ;;  %204 = vmatprep.mubr.bf16.mxu0 %v778_v34  ;;  %v979_v43 = vld [vmem:[#allocation3 + $0x188] sm:$0xff]   ;;  %v982_v46 = vld [vmem:[#allocation3 + $0x110] sm:$0xff]   ;;  %v986_v50 = vld [vmem:[#allocation3 + $0x118] sm:$0xff]  }
  0x23   :  { %872 = vmatpush3.bf16.msra.mxu1 %v953_v16  ;;  %851 = vmatprep.subr.bf16.mxu0 %v954_v17  ;;  %v983_v47 = vld [vmem:[#allocation3 + $0x190] sm:$0xff]   ;;  %v987_v51 = vld [vmem:[#allocation3 + $0x198] sm:$0xff]   ;;  %v988_v52 = vld [vmem:[#allocation3 + $0x160] sm:$0xff]   ;;  %v729_v17 = vlaneseq }
  0x24   :  { %873 = vmatprep.subr.bf16.mxu1 %v955_v18  ;;  %373 = vmatprep.mubr.bf16.mxu1 %v778_v34  ;;  %v989_v53 = vld [vmem:[#allocation3 + $0x1e0] sm:$0xff]   ;;  %v992_v56 = vld [vmem:[#allocation3 + $0x168] sm:$0xff]   ;;  %v996_v60 = vld [vmem:[#allocation3 + $0x170] sm:$0xff]  }
  0x25   :  { %v990_v54 = vld [vmem:[#allocation3 + $0x120] sm:$0xff]   ;;  %v993_v57 = vld [vmem:[#allocation3 + $0x1e8] sm:$0xff]   ;;  %v997_v61 = vld [vmem:[#allocation3 + $0x1f0] sm:$0xff]  }
  0x26   :  { %852 = vmatpush3.bf16.msra.mxu0 %v956_v19  ;;  %v991_v55 = vld [vmem:[#allocation3 + $0x1a0] sm:$0xff]   ;;  %v994_v58 = vld [vmem:[#allocation3 + $0x128] sm:$0xff]   ;;  %v998_v62 = vld [vmem:[#allocation3 + $0x130] sm:$0xff]  }
  0x27   :  { %874 = vmatpush3.bf16.msra.mxu1 %v957_v20  ;;  %853 = vmatprep.subr.bf16.mxu0 %v958_v21  ;;  %v995_v59 = vld [vmem:[#allocation3 + $0x1a8] sm:$0xff]   ;;  %v999_v63 = vld [vmem:[#allocation3 + $0x1b0] sm:$0xff]   ;;  %v1000_v1 = vld [vmem:[#allocation3 + $0x178] sm:$0xff]  }
  0x28   :  { %875 = vmatprep.subr.bf16.mxu1 %v959_v22  ;;  %v1001_v2 = vld [vmem:[#allocation3 + $0x1f8] sm:$0xff]  }
  0x29   :  { %v1002_v3 = vld [vmem:[#allocation3 + $0x138] sm:$0xff]  }
  0x2a   :  { %854 = vmatpush3.bf16.msra.mxu0 %v960_v23  ;;  %v1003_v4 = vld [vmem:[#allocation3 + $0x1b8] sm:$0xff]  }
  0x2b   :  { %876 = vmatpush3.bf16.msra.mxu1 %v961_v24  ;;  %855 = vmatprep.subr.bf16.mxu0 %v962_v25  ;;  %v722_v5 = vld [vmem:[%s1121_s2] sm:$0xff]  ;;  %s1056_s2 = smov [#allocation6]  }
  0x2c   :  { %877 = vmatprep.subr.bf16.mxu1 %v963_v26  ;;  %725 = vperm.xlu0 %936, %v722_v5   ;;  %v730_v26 = vand.u32 127, %v729_v17  ;;  %s768_s28 = sshll.u32 %s1056_s2, 4  ;;  %s769_s28 = int_to_ptr.vmem [resolvable:$true] %s768_s28 }
  0x2d   :  { %s1026_s29 = scalar_lea.vmem %s769_s28, 128  ;;  %p1031_p9 = scmp.lt.s32.totalorder %s769_s28, %s769_s28 }
  0x2e   :  { %856 = vmatpush3.bf16.msra.mxu0 %v964_v27  ;;  %vm734_vm1 = vcmp.lt.s32.totalorder %v730_v26, 16  ;;  %p1027_p8 = scmp.ne.s32.totalorder %s769_s28, %s1026_s29  ;;  %p1032_p10 = scmp.lt.s32.totalorder %s1026_s29, %s1026_s29 }
  0x2f   :  { %878 = vmatpush3.bf16.msra.mxu1 %v965_v28  ;;  %857 = vmatprep.subr.bf16.mxu0 %v966_v29 }
  0x30   :  { %879 = vmatprep.subr.bf16.mxu1 %v967_v30  ;;  %p1033_p11 = por %p1032_p10, %p1031_p9 }
  0x32   :  { %858 = vmatpush3.bf16.msra.mxu0 %v968_v31  ;;  %p1034_p12 = pnand %p1033_p11, %p1027_p8 }
  0x33   :  { %880 = vmatpush3.bf16.msra.mxu1 %v969_v32  ;;  %887 = vmatprep.subr.bf16.mxu0 %v972_v36 }
  0x34   :  { %909 = vmatprep.subr.bf16.mxu1 %v973_v37 }
  0x35   :  { %205 = vmatmul.mubr.bf16.vlgmr.msra.gmra.mrb[0].mxu0 %v1096_v35 }
  0x36   :  { %374 = vmatmul.mubr.bf16.vlgmr.msra.gmra.mrb[0].mxu1 %v1096_v35  ;;  %888 = vmatpush3.bf16.msra.mxu0 %v974_v38 }
  0x37   :  { %910 = vmatpush3.bf16.msra.mxu1 %v975_v39  ;;  %889 = vmatprep.subr.bf16.mxu0 %v976_v40 }
  0x38   :  { %543 = vmatprep.mubr.bf16.mxu0 %v778_v34  ;;  %911 = vmatprep.subr.bf16.mxu1 %v977_v41 }
  0x39   :  { %713 = vmatprep.mubr.bf16.mxu1 %v778_v34 }
  0x3a   :  { %890 = vmatpush3.bf16.msra.mxu0 %v978_v42  ;;  %v736_v42 = vld [vmem:[#allocation2] sm:$0xff] }
  0x3b   :  { %912 = vmatpush3.bf16.msra.mxu1 %v979_v43  ;;  %891 = vmatprep.subr.bf16.mxu0 %v980_v44 }
  0x3c   :  { %913 = vmatprep.subr.bf16.mxu1 %v981_v45 }
  0x3e   :  { %892 = vmatpush3.bf16.msra.mxu0 %v982_v46 }
  0x3f   :  { %914 = vmatpush3.bf16.msra.mxu1 %v983_v47  ;;  %893 = vmatprep.subr.bf16.mxu0 %v984_v48 }
  0x40   :  { %915 = vmatprep.subr.bf16.mxu1 %v985_v49 }
  0x42   :  { %894 = vmatpush3.bf16.msra.mxu0 %v986_v50 }
  0x43   :  { %916 = vmatpush3.bf16.msra.mxu1 %v987_v51  ;;  %895 = vmatprep.subr.bf16.mxu0 %v988_v52 }
  0x44   :  { %917 = vmatprep.subr.bf16.mxu1 %v989_v53 }
  0x46   :  { %896 = vmatpush3.bf16.msra.mxu0 %v990_v54 }
  0x47   :  { %918 = vmatpush3.bf16.msra.mxu1 %v991_v55  ;;  %897 = vmatprep.subr.bf16.mxu0 %v992_v56 }
  0x48   :  { %919 = vmatprep.subr.bf16.mxu1 %v993_v57 }
  0x4a   :  { %898 = vmatpush3.bf16.msra.mxu0 %v994_v58 }
  0x4b   :  { %920 = vmatpush3.bf16.msra.mxu1 %v995_v59  ;;  %899 = vmatprep.subr.bf16.mxu0 %v996_v60 }
  0x4c   :  { %921 = vmatprep.subr.bf16.mxu1 %v997_v61 }
  0x4e   :  { %900 = vmatpush3.bf16.msra.mxu0 %v998_v62 }
  0x4f   :  { %922 = vmatpush3.bf16.msra.mxu1 %v999_v63  ;;  %901 = vmatprep.subr.bf16.mxu0 %v1000_v1 }
  0x50   :  { %923 = vmatprep.subr.bf16.mxu1 %v1001_v2 }
  0x52   :  { %902 = vmatpush3.bf16.msra.mxu0 %v1002_v3 }
  0x53   :  { %924 = vmatpush3.bf16.msra.mxu1 %v1003_v4 }
  0x55   :  { %544 = vmatmul.mubr.bf16.vlgmr.msra.gmra.mrb[4].mxu0 %v1096_v35 }
  0x56   :  { %714 = vmatmul.mubr.bf16.vlgmr.msra.gmra.mrb[4].mxu1 %v1096_v35 }
  0xab   :  { %v726_v30 = vpop.permute.xlu0 %725 }
 0x108   :  { %v859_v6 = vpop.f32.mrb[0].mxu0 }
 0x109   :  { %v881_v7 = vpop.f32.mrb[0].mxu1  ;;  %v860_v8 = vpop.f32.mrb[1].mxu0 }
 0x10a   :  { %v882_v9 = vpop.f32.mrb[1].mxu1  ;;  %v861_v10 = vadd.f32 %v860_v8, %v859_v6  ;;  %v862_v12 = vpop.f32.mrb[2].mxu0 }
 0x10b   :  { %v883_v11 = vadd.f32 %v882_v9, %v881_v7  ;;  %v884_v13 = vpop.f32.mrb[2].mxu1  ;;  %v863_v14 = vpop.f32.mrb[3].mxu0 }
 0x10c   :  { %v885_v15 = vpop.f32.mrb[3].mxu1 }
 0x10d   :  { %v381_v16 = vmax.f32 %v861_v10, %v883_v11 }
 0x128   :  { %v903_v18 = vpop.f32.mrb[4].mxu0 }
 0x129   :  { %v925_v19 = vpop.f32.mrb[4].mxu1  ;;  %v904_v20 = vpop.f32.mrb[5].mxu0 }
 0x12a   :  { %v926_v21 = vpop.f32.mrb[5].mxu1  ;;  %v905_v22 = vadd.f32 %v904_v20, %v903_v18  ;;  %v906_v24 = vpop.f32.mrb[6].mxu0 }
 0x12b   :  { %v927_v23 = vadd.f32 %v926_v21, %v925_v19  ;;  %v928_v25 = vpop.f32.mrb[6].mxu1  ;;  %v907_v27 = vpop.f32.mrb[7].mxu0 }
 0x12c   :  { %v929_v28 = vpop.f32.mrb[7].mxu1  ;;  %v551_v29 = vmax.f32 %v381_v16, %v905_v22 }
 0x12e   :  { %v721_v31 = vmax.f32 %v551_v29, %v927_v23 }
 0x130   :  { %vm728_vm2 = vcmp.gt.f32.partialorder %v721_v31, %v726_v30 }
 0x131   :  { %vm735_vm3 = vmand %vm728_vm2, %vm734_vm1 }
 0x132   :  { %v737_v32 = vsel %vm735_vm3, 1, %v1055_v0 }
 0x133   :  { %v739_v33 = vshrl.u32 %v737_v32, 16  ;;  %v738_v34 = vand.u32 65535, %v737_v32 }
 0x135   :  { %v741_v35 = vcvt.s32.f32 %v739_v33  ;;  %v740_v36 = vcvt.s32.f32 %v738_v34 }
 0x137   :  { %744 = vadd.xlane.f32.xlu0 %v741_v35  ;;  %742 = vadd.xlane.f32.xlu1 %v740_v36 }
 0x1c4   :  { %v745_v37 = vpop.xlane.xlu0 %744  ;;  %v743_v38 = vpop.xlane.xlu1 %742 }
 0x1c5   :  { %v747_v39 = vcvt.f32.s32 %v745_v37  ;;  %v746_v41 = vcvt.f32.s32 %v743_v38 }
 0x1c7   :  { %v748_v40 = vshll.u32 %v747_v39, 16 }
 0x1c9   :  { %v749_v43 = vadd.s32 %v748_v40, %v746_v41 }
 0x1cb   :  { %v750_v44 = vadd.s32 %v749_v43, %v736_v42 }
 0x1cd   :  { %752 = vst.msk [vmem:[#allocation2] sm:$0xff] %vm34_vm0, %v750_v44 }
 0x1d4   :  { %v756_v45 = vld [vmem:[#allocation2] sm:$0xff] }
 0x1d5   :  { %v757_v46 = vadd.s32 1, %v756_v45 }
 0x1d7   :  { %759 = vperm.xlu1 %937, %v757_v46  }
 0x256   :  { %v760_v0 = vpop.permute.xlu1 %759 }
 0x257   :  { %761 = vst [vmem:[#allocation6] sm:$0xff] %v760_v0 }
 0x258   :  { %1037 = shalt.err (!%p1034_p12)
}
 0x259   :  { %s1038_s5 = scalar_lea.hbm %s1122_s3, 128 }
 0x25a   :  { %p1039_p13 = scmp.ne.s32.totalorder %s1122_s3, %s1038_s5  ;;  %p1042_p0 = scmp.lt.u32.totalorder %s1038_s5, %s1122_s3 }
 0x25c   :  { %p1044_p1 = pnand %p1042_p0, %p1039_p13 }
 0x25e   :  { %1047 = shalt.err (!%p1044_p1)
}
 0x25f   :  { %771 = dma.vmem_to_hbm [thread:$0]  %s769_s28, 128, %s1122_s3, [#allocation5]  }
 0x260   :  { %1050 = dma.done.wait [#allocation5], 128  }
 0x261   :  { %1051 = vsyncadd [#allocation5], 4294967168 }
 0x262   :  { %775 = vsyncpa [#allocation4], 1 }
 0x263   :  { %776 = vsyncpa [#allocation5], 1 }

</bundles_post_ra>
